<compile_context>
chip_gen: v7x
topology: tpu7x:2x2x1
jax: 0.10.0
libtpu: 0.0.40
codegen_flags: <defaults>
</compile_context>

<pallas_src>
import jax
import jax.numpy as jnp
import numpy as np
from jax.experimental import pallas as pl
from jax.experimental.pallas import tpu as pltpu

VOCAB = 48            # nn.Embedding(48, 8)
D = 8                 # input_dim
HIDDEN = 32           # k_linear out
K = 3                 # spline order
NUM = 3               # base grid intervals
G = NUM + 1 + 2 * K   # 10 grid points after extension
N_COEF = G - K - 1    # 6 spline bases per input dim
LANE_G = 16           # padded per-dim basis slots
LANES = D * LANE_G    # 128 -> exactly one vreg lane width

# ---------------------------------------------------------------------------
# Consolidated constant table: one lane-dense (N_CONST_PAD, 128) array.
#   rows 0..47   : id -> folded spline coefficients (scale_sp pre-multiplied)
#   rows 48..55  : budget-dim -> 16-lane-slot expand matrix (0/1)
#   rows 56..60  : shifted grid values Gs[s] = grid[d, i+s], s = 0..K+1
#   next 4/3/2   : per-level reciprocal rows r_{k,m} = 1/(g[i+m+k]-g[i+m])
#   last row     : scale_base / LANE_G (per-lane SiLU weight)
# ---------------------------------------------------------------------------
ROW_TABLE = 0
ROW_EXPAND = ROW_TABLE + VOCAB
ROW_GRID = ROW_EXPAND + D
_RECIP_ROW0 = {}
_r = ROW_GRID + (K + 2)
for _k in range(1, K + 1):
    _RECIP_ROW0[_k] = _r
    _r += K - _k + 2                       # level k keeps K-k+2 reciprocal rows
ROW_CBASE = _r
N_CONST_ROWS = ROW_CBASE + 1               # 71
N_CONST_PAD = (N_CONST_ROWS + 7) // 8 * 8  # 72


def _round_up(x, m):
    return (x + m - 1) // m * m


def _extend_grid(grid, k_extend):
    # grid: (D, G0) -> (D, G0 + 2*k_extend); mirrors torch extend_grid
    h = (grid[:, -1:] - grid[:, :1]) / (grid.shape[1] - 1)
    for _ in range(k_extend):
        grid = jnp.concatenate([grid[:, :1] - h, grid], axis=1)
        grid = jnp.concatenate([grid, grid[:, -1:] + h], axis=1)
    return grid


# ---------------------------------------------------------------------------
# Kernel
# ---------------------------------------------------------------------------
def simplenet_kernel(ids_ref, budget_ref, consts_ref, out_ref):
    tb = budget_ref.shape[0]
    budget = budget_ref[...]                                     # (TB, 8) f32

    # Broadcast each budget dim across its 16-lane slot with one tiny MXU
    # matmul against the 0/1 expand block (keeps cross-lane work off the VPU).
    x = jnp.dot(budget, consts_ref[ROW_EXPAND:ROW_EXPAND + D, :],
                preferred_element_type=jnp.float32)              # (TB, 128)

    gs = [consts_ref[ROW_GRID + s:ROW_GRID + s + 1, :] for s in range(K + 2)]

    # Hoisted numerator differences shared across all recursion levels.
    xm = [x - gs[s] for s in range(K)]                           # x - g[i+s]
    mgx = {j: gs[j] - x for j in range(2, K + 2)}                # g[i+j] - x

    # Level 0: pure boolean indicators (no cast, no multiply).
    b0 = [(x >= gs[s]) & (x < gs[s + 1]) for s in range(K + 1)]

    # Level 1: fold the indicator cast+mul into a select against the
    # precomputed reciprocal row (rr_{k,s} == rl_{k,s+1} => one row family).
    r1 = [consts_ref[_RECIP_ROW0[1] + m:_RECIP_ROW0[1] + m + 1, :]
          for m in range(K + 1)]
    t = [jnp.where(b0[m], r1[m], 0.0) for m in range(K + 1)]
    v = [xm[s] * t[s] + mgx[s + 2] * t[s + 1] for s in range(K)]

    # Levels 2..K: divide-free, shift-free Cox-de Boor; pre-scaled neighbour
    # terms t_m = r_{k,m} * v[m] are reused by both adjacent output shifts.
    for k in range(2, K + 1):
        rk = [consts_ref[_RECIP_ROW0[k] + m:_RECIP_ROW0[k] + m + 1, :]
              for m in range(K - k + 2)]
        t = [rk[m] * v[m] for m in range(K - k + 2)]
        v = [xm[s] * t[s] + mgx[s + k + 1] * t[s + 1]
             for s in range(K - k + 1)]
    spl = v[0]                                                   # (TB, 128)

    # id -> lane-dense coefficients (scale_sp folded in) via one-hot matmul.
    # Placed late so coef's (TB,128) live range does not span the recursion.
    ids = ids_ref[...]                                           # (TB, 1) i32
    iota = jax.lax.broadcasted_iota(jnp.int32, (tb, VOCAB), 1)
    onehot = (iota == ids).astype(jnp.float32)                   # (TB, 48)
    coef = jnp.dot(onehot, consts_ref[ROW_TABLE:ROW_TABLE + VOCAB, :],
                   preferred_element_type=jnp.float32)           # (TB, 128)

    # SiLU base path folded into the 128-lane layout.  Each budget dim is
    # replicated 16x, so the per-lane weight is scale_base/16 (ROW_CBASE).
    # silu(x) = x*sigmoid(x) = 0.5*x*(tanh(0.5*x)+1): tanh rides the EUP slot,
    # no f32 divide on the saturated VALU slot.
    hx = 0.5 * x
    sil = (consts_ref[ROW_CBASE:ROW_CBASE + 1, :] * hx) * (jnp.tanh(hx) + 1.0)

    # Single fused reduction over the 128 lanes on the otherwise idle MXU.
    combined = spl * coef + sil
    out_ref[...] = jnp.dot(combined, jnp.ones((LANES, 1), jnp.float32),
                           preferred_element_type=jnp.float32)   # (TB, 1)


# ---------------------------------------------------------------------------
# Parameter init (mirrors the torch module) and kernel-constant precompute.
# ---------------------------------------------------------------------------
def init_params(key):
    ks = jax.random.split(key, 6)
    emb = jax.random.normal(ks[0], (VOCAB, D), jnp.float32)
    w1 = jax.random.normal(ks[1], (D, HIDDEN), jnp.float32) / np.sqrt(D)
    b1 = jax.random.normal(ks[2], (HIDDEN,), jnp.float32) * 0.01
    w2 = jax.random.normal(ks[3], (HIDDEN, D * N_COEF), jnp.float32) / np.sqrt(HIDDEN)
    b2 = jax.random.normal(ks[4], (D * N_COEF,), jnp.float32) * 0.01
    base_grid = jnp.broadcast_to(jnp.linspace(-1.0, 1.0, NUM + 1), (D, NUM + 1))
    grid = _extend_grid(base_grid, K).astype(jnp.float32)                 # (8, 10)
    scale_base = (jax.random.uniform(ks[5], (1, 1)) * 2.0 - 1.0).astype(jnp.float32)
    scale_sp = jnp.ones((D, 1), jnp.float32) / np.sqrt(D)
    return dict(emb=emb, w1=w1, b1=b1, w2=w2, b2=b2, grid=grid,
                scale_base=scale_base, scale_sp=scale_sp)


def build_kernel_consts(p):
    """Build the single consolidated (N_CONST_PAD, 128) constant operand."""
    # Fold the id-only MLP into a (VOCAB, 128) lane-dense coefficient table,
    # with scale_sp pre-multiplied per input dim and zeros in padding lanes.
    h = jnp.maximum(p["emb"] @ p["w1"] + p["b1"], 0.0)                    # (48, 32)
    coef = (h @ p["w2"] + p["b2"]).reshape(VOCAB, D, N_COEF)              # (48, 8, 6)
    coef = coef * p["scale_sp"][None, :, :]                               # fold scale_sp
    table = np.asarray(jnp.pad(coef, ((0, 0), (0, 0), (0, LANE_G - N_COEF)))
                       .reshape(VOCAB, LANES), dtype=np.float32)          # (48, 128)

    rows = np.zeros((N_CONST_PAD, LANES), dtype=np.float32)
    rows[ROW_TABLE:ROW_TABLE + VOCAB] = table
    rows[ROW_EXPAND:ROW_EXPAND + D] = np.repeat(
        np.eye(D, dtype=np.float32), LANE_G, axis=1)                      # (8, 128)

    g = np.asarray(p["grid"], dtype=np.float32)                           # (8, 10)
    i_idx = np.arange(LANE_G)
    # Shifted grid values (clamped index => padding-lane indicators are 0; any
    # lane the clamp affects is multiplied by a zero coefficient at the end).
    for s in range(K + 2):
        idx = np.minimum(i_idx + s, G - 1)
        rows[ROW_GRID + s] = g[:, idx].reshape(-1)
    # Per-level reciprocal rows; clamped indices keep every value finite.
    for k in range(1, K + 1):
        for m in range(K - k + 2):
            jc = np.minimum(i_idx + m, G - 1 - k)
            rows[_RECIP_ROW0[k] + m] = (1.0 / (g[:, jc + k] - g[:, jc])).reshape(-1)
    # Per-lane SiLU weight (each budget dim is replicated LANE_G times).
    rows[ROW_CBASE] = float(np.asarray(p["scale_base"])[0, 0]) / LANE_G
    return jnp.asarray(rows)


# ---------------------------------------------------------------------------
# Wrapper: 1-D batch grid, parallel dimension semantics, scaled vmem limit.
# ---------------------------------------------------------------------------
def simplenet_forward(x_ids, budget, kconsts, *, tile_b=4096):
    B = x_ids.shape[0]
    tile_b = max(8, min(_round_up(tile_b, 8), _round_up(B, 8)))
    n_tiles = -(-B // tile_b)
    # Even number of tiles (when > 1) so the "parallel" grid axis can
    # load-balance across v7x's two TensorCores.
    if n_tiles > 1 and n_tiles % 2:
        n_tiles += 1
        tile_b = _round_up(-(-B // n_tiles), 8)
        n_tiles = -(-B // tile_b)
        if n_tiles % 2:
            n_tiles += 1
    b_pad = n_tiles * tile_b

    ids2d = jnp.pad(x_ids.astype(jnp.int32).reshape(B, 1), ((0, b_pad - B), (0, 0)))
    budget_p = jnp.pad(budget.astype(jnp.float32), ((0, b_pad - B), (0, 0)))

    # ~20-24 live (tile_b, 128) f32 temporaries; 48 MiB at the default tile
    # (safe on v7x's 64 MiB VMEM), larger only if a bigger tile is requested.
    vmem_bytes = int(min(100 * 2**20, max(32 * 2**20, 24 * tile_b * LANES * 4)))

    out = pl.pallas_call(
        simplenet_kernel,
        out_shape=jax.ShapeDtypeStruct((b_pad, 1), jnp.float32),
        grid=(n_tiles,),
        in_specs=[
            pl.BlockSpec((tile_b, 1), lambda i: (i, 0)),                  # ids
            pl.BlockSpec((tile_b, D), lambda i: (i, 0)),                  # budget
            pl.BlockSpec((N_CONST_PAD, LANES), lambda i: (0, 0)),         # constants
        ],
        out_specs=pl.BlockSpec((tile_b, 1), lambda i: (i, 0)),
        compiler_params=pltpu.CompilerParams(
            dimension_semantics=("parallel",),
            vmem_limit_bytes=vmem_bytes,
        ),
    )(ids2d, budget_p, kconsts)
    return out[:B]


# ---------------------------------------------------------------------------
# Pure-JAX reference mirroring the PyTorch forward exactly.
# ---------------------------------------------------------------------------
def _b_batch_ref(x, grid, k):
    x = x[:, :, None]
    g = grid[None, :, :]
    value = jnp.logical_and(x >= g[:, :, :-1], x < g[:, :, 1:]).astype(jnp.float32)
    for kk in range(1, k + 1):
        left = (x - g[:, :, :-(kk + 1)]) / (g[:, :, kk:-1] - g[:, :, :-(kk + 1)])
        right = (g[:, :, kk + 1:] - x) / (g[:, :, kk + 1:] - g[:, :, 1:-kk])
        value = left * value[:, :, :-1] + right * value[:, :, 1:]
        value = jnp.nan_to_num(value)
    return value


def simplenet_reference(x_ids, budget, p):
    emb = p["emb"][x_ids]
    h = jnp.maximum(emb @ p["w1"] + p["b1"], 0.0)
    coef = (h @ p["w2"] + p["b2"]).reshape(-1, D, N_COEF)
    spl = _b_batch_ref(budget, p["grid"], K)
    y = jnp.einsum("bdj,bdj->bd", spl, coef)
    base = budget * jax.nn.sigmoid(budget)
    y = p["scale_base"][0, 0] * base + p["scale_sp"][:, 0][None, :] * y
    return jnp.sum(y, axis=1, keepdims=True)


if __name__ == "__main__":
    key = jax.random.PRNGKey(0)
    kparam, kx, kb = jax.random.split(key, 3)
    params = init_params(kparam)
    kconsts = build_kernel_consts(params)

    # Small primary check (single tile).
    B = 16
    x_ids = jax.random.randint(kx, (B,), 0, VOCAB, dtype=jnp.int32)
    budget = jax.random.uniform(kb, (B, D), jnp.float32, minval=-1.0, maxval=1.0)
    out = jax.block_until_ready(simplenet_forward(x_ids, budget, kconsts))
    ref = simplenet_reference(x_ids, budget, params)
    np.testing.assert_allclose(np.asarray(out), np.asarray(ref), rtol=1e-4, atol=1e-4)

    # Secondary check exercising multi-tile grid, even-grid rounding + padding.
    B2 = 600
    kx2, kb2 = jax.random.split(kx)
    x_ids2 = jax.random.randint(kx2, (B2,), 0, VOCAB, dtype=jnp.int32)
    budget2 = jax.random.uniform(kb2, (B2, D), jnp.float32, minval=-1.0, maxval=1.0)
    out2 = jax.block_until_ready(simplenet_forward(x_ids2, budget2, kconsts, tile_b=256))
    ref2 = simplenet_reference(x_ids2, budget2, params)
    np.testing.assert_allclose(np.asarray(out2), np.asarray(ref2), rtol=1e-4, atol=1e-4)

    print("KERNEL_OK")
</pallas_src>

<mosaic_0001>
module attributes {stable_mosaic.version = 11 : i64} {
  func.func @simplenet_kernel(%arg0: i32, %arg1: memref<16x1xi32, #tpu.memory_space<vmem>>, %arg2: memref<16x8xf32, #tpu.memory_space<vmem>>, %arg3: memref<72x128xf32, #tpu.memory_space<vmem>>, %arg4: memref<16x1xf32, #tpu.memory_space<vmem>>) attributes {dimension_semantics = [#tpu.dimension_semantics<parallel>], iteration_bounds = array<i64: 1>, scalar_prefetch = 0 : i64, scratch_operands = 0 : i64, tpu.core_type = #tpu.core_type<tc>, window_params = [{transform_indices = @transform_0, window_bounds = array<i64: 16, 1>}, {transform_indices = @transform_1, window_bounds = array<i64: 16, 8>}, {pipeline_mode = #tpu.pipeline_mode<synchronous>, transform_indices = @transform_2, window_bounds = array<i64: 72, 128>}, {transform_indices = @transform_3, window_bounds = array<i64: 16, 1>}]} {
    %c0 = arith.constant 0 : index
    %c0_0 = arith.constant 0 : index
    %0 = vector.load %arg2[%c0, %c0_0] : memref<16x8xf32, #tpu.memory_space<vmem>>, vector<16x8xf32>
    %c48 = arith.constant 48 : index
    %c0_1 = arith.constant 0 : index
    %1 = vector.load %arg3[%c48, %c0_1] : memref<72x128xf32, #tpu.memory_space<vmem>>, vector<8x128xf32>
    %cst = arith.constant dense<0.000000e+00> : vector<16x128xf32>
    %2 = tpu.matmul %0, %1, %cst {dimension_numbers = #tpu.dot_dimension_numbers<[1], [0], [0], [1], [0, 0, 1, 1], [], []>} : vector<16x8xf32>, vector<8x128xf32>, vector<16x128xf32> -> vector<16x128xf32>
    %c56 = arith.constant 56 : index
    %c0_2 = arith.constant 0 : index
    %3 = vector.load %arg3[%c56, %c0_2] : memref<72x128xf32, #tpu.memory_space<vmem>>, vector<1x128xf32>
    %c57 = arith.constant 57 : index
    %c0_3 = arith.constant 0 : index
    %4 = vector.load %arg3[%c57, %c0_3] : memref<72x128xf32, #tpu.memory_space<vmem>>, vector<1x128xf32>
    %c58 = arith.constant 58 : index
    %c0_4 = arith.constant 0 : index
    %5 = vector.load %arg3[%c58, %c0_4] : memref<72x128xf32, #tpu.memory_space<vmem>>, vector<1x128xf32>
    %c59 = arith.constant 59 : index
    %c0_5 = arith.constant 0 : index
    %6 = vector.load %arg3[%c59, %c0_5] : memref<72x128xf32, #tpu.memory_space<vmem>>, vector<1x128xf32>
    %c60 = arith.constant 60 : index
    %c0_6 = arith.constant 0 : index
    %7 = vector.load %arg3[%c60, %c0_6] : memref<72x128xf32, #tpu.memory_space<vmem>>, vector<1x128xf32>
    %8 = vector.broadcast %3 : vector<1x128xf32> to vector<16x128xf32>
    %9 = arith.subf %2, %8 : vector<16x128xf32>
    %10 = vector.broadcast %4 : vector<1x128xf32> to vector<16x128xf32>
    %11 = arith.subf %2, %10 : vector<16x128xf32>
    %12 = vector.broadcast %5 : vector<1x128xf32> to vector<16x128xf32>
    %13 = arith.subf %2, %12 : vector<16x128xf32>
    %14 = vector.broadcast %5 : vector<1x128xf32> to vector<16x128xf32>
    %15 = arith.subf %14, %2 : vector<16x128xf32>
    %16 = vector.broadcast %6 : vector<1x128xf32> to vector<16x128xf32>
    %17 = arith.subf %16, %2 : vector<16x128xf32>
    %18 = vector.broadcast %7 : vector<1x128xf32> to vector<16x128xf32>
    %19 = arith.subf %18, %2 : vector<16x128xf32>
    %20 = vector.broadcast %3 : vector<1x128xf32> to vector<16x128xf32>
    %21 = arith.cmpf oge, %2, %20 : vector<16x128xf32>
    %22 = vector.broadcast %4 : vector<1x128xf32> to vector<16x128xf32>
    %23 = arith.cmpf olt, %2, %22 : vector<16x128xf32>
    %24 = arith.andi %21, %23 : vector<16x128xi1>
    %25 = vector.broadcast %4 : vector<1x128xf32> to vector<16x128xf32>
    %26 = arith.cmpf oge, %2, %25 : vector<16x128xf32>
    %27 = vector.broadcast %5 : vector<1x128xf32> to vector<16x128xf32>
    %28 = arith.cmpf olt, %2, %27 : vector<16x128xf32>
    %29 = arith.andi %26, %28 : vector<16x128xi1>
    %30 = vector.broadcast %5 : vector<1x128xf32> to vector<16x128xf32>
    %31 = arith.cmpf oge, %2, %30 : vector<16x128xf32>
    %32 = vector.broadcast %6 : vector<1x128xf32> to vector<16x128xf32>
    %33 = arith.cmpf olt, %2, %32 : vector<16x128xf32>
    %34 = arith.andi %31, %33 : vector<16x128xi1>
    %35 = vector.broadcast %6 : vector<1x128xf32> to vector<16x128xf32>
    %36 = arith.cmpf oge, %2, %35 : vector<16x128xf32>
    %37 = vector.broadcast %7 : vector<1x128xf32> to vector<16x128xf32>
    %38 = arith.cmpf olt, %2, %37 : vector<16x128xf32>
    %39 = arith.andi %36, %38 : vector<16x128xi1>
    %c61 = arith.constant 61 : index
    %c0_7 = arith.constant 0 : index
    %40 = vector.load %arg3[%c61, %c0_7] : memref<72x128xf32, #tpu.memory_space<vmem>>, vector<1x128xf32>
    %c62 = arith.constant 62 : index
    %c0_8 = arith.constant 0 : index
    %41 = vector.load %arg3[%c62, %c0_8] : memref<72x128xf32, #tpu.memory_space<vmem>>, vector<1x128xf32>
    %c63 = arith.constant 63 : index
    %c0_9 = arith.constant 0 : index
    %42 = vector.load %arg3[%c63, %c0_9] : memref<72x128xf32, #tpu.memory_space<vmem>>, vector<1x128xf32>
    %c64 = arith.constant 64 : index
    %c0_10 = arith.constant 0 : index
    %43 = vector.load %arg3[%c64, %c0_10] : memref<72x128xf32, #tpu.memory_space<vmem>>, vector<1x128xf32>
    %cst_11 = arith.constant 0.000000e+00 : f32
    %44 = vector.shape_cast %40 : vector<1x128xf32> to vector<1x128xf32>
    %45 = vector.broadcast %44 : vector<1x128xf32> to vector<16x128xf32>
    %46 = vector.broadcast %cst_11 : f32 to vector<16x128xf32>
    %47 = arith.select %24, %45, %46 : vector<16x128xi1>, vector<16x128xf32>
    %cst_12 = arith.constant 0.000000e+00 : f32
    %48 = vector.shape_cast %41 : vector<1x128xf32> to vector<1x128xf32>
    %49 = vector.broadcast %48 : vector<1x128xf32> to vector<16x128xf32>
    %50 = vector.broadcast %cst_12 : f32 to vector<16x128xf32>
    %51 = arith.select %29, %49, %50 : vector<16x128xi1>, vector<16x128xf32>
    %cst_13 = arith.constant 0.000000e+00 : f32
    %52 = vector.shape_cast %42 : vector<1x128xf32> to vector<1x128xf32>
    %53 = vector.broadcast %52 : vector<1x128xf32> to vector<16x128xf32>
    %54 = vector.broadcast %cst_13 : f32 to vector<16x128xf32>
    %55 = arith.select %34, %53, %54 : vector<16x128xi1>, vector<16x128xf32>
    %cst_14 = arith.constant 0.000000e+00 : f32
    %56 = vector.shape_cast %43 : vector<1x128xf32> to vector<1x128xf32>
    %57 = vector.broadcast %56 : vector<1x128xf32> to vector<16x128xf32>
    %58 = vector.broadcast %cst_14 : f32 to vector<16x128xf32>
    %59 = arith.select %39, %57, %58 : vector<16x128xi1>, vector<16x128xf32>
    %60 = arith.mulf %9, %47 : vector<16x128xf32>
    %61 = arith.mulf %15, %51 : vector<16x128xf32>
    %62 = arith.addf %60, %61 : vector<16x128xf32>
    %63 = arith.mulf %11, %51 : vector<16x128xf32>
    %64 = arith.mulf %17, %55 : vector<16x128xf32>
    %65 = arith.addf %63, %64 : vector<16x128xf32>
    %66 = arith.mulf %13, %55 : vector<16x128xf32>
    %67 = arith.mulf %19, %59 : vector<16x128xf32>
    %68 = arith.addf %66, %67 : vector<16x128xf32>
    %c65 = arith.constant 65 : index
    %c0_15 = arith.constant 0 : index
    %69 = vector.load %arg3[%c65, %c0_15] : memref<72x128xf32, #tpu.memory_space<vmem>>, vector<1x128xf32>
    %c66 = arith.constant 66 : index
    %c0_16 = arith.constant 0 : index
    %70 = vector.load %arg3[%c66, %c0_16] : memref<72x128xf32, #tpu.memory_space<vmem>>, vector<1x128xf32>
    %c67 = arith.constant 67 : index
    %c0_17 = arith.constant 0 : index
    %71 = vector.load %arg3[%c67, %c0_17] : memref<72x128xf32, #tpu.memory_space<vmem>>, vector<1x128xf32>
    %72 = vector.broadcast %69 : vector<1x128xf32> to vector<16x128xf32>
    %73 = arith.mulf %72, %62 : vector<16x128xf32>
    %74 = vector.broadcast %70 : vector<1x128xf32> to vector<16x128xf32>
    %75 = arith.mulf %74, %65 : vector<16x128xf32>
    %76 = vector.broadcast %71 : vector<1x128xf32> to vector<16x128xf32>
    %77 = arith.mulf %76, %68 : vector<16x128xf32>
    %78 = arith.mulf %9, %73 : vector<16x128xf32>
    %79 = arith.mulf %17, %75 : vector<16x128xf32>
    %80 = arith.addf %78, %79 : vector<16x128xf32>
    %81 = arith.mulf %11, %75 : vector<16x128xf32>
    %82 = arith.mulf %19, %77 : vector<16x128xf32>
    %83 = arith.addf %81, %82 : vector<16x128xf32>
    %c68 = arith.constant 68 : index
    %c0_18 = arith.constant 0 : index
    %84 = vector.load %arg3[%c68, %c0_18] : memref<72x128xf32, #tpu.memory_space<vmem>>, vector<1x128xf32>
    %c69 = arith.constant 69 : index
    %c0_19 = arith.constant 0 : index
    %85 = vector.load %arg3[%c69, %c0_19] : memref<72x128xf32, #tpu.memory_space<vmem>>, vector<1x128xf32>
    %86 = vector.broadcast %84 : vector<1x128xf32> to vector<16x128xf32>
    %87 = arith.mulf %86, %80 : vector<16x128xf32>
    %88 = vector.broadcast %85 : vector<1x128xf32> to vector<16x128xf32>
    %89 = arith.mulf %88, %83 : vector<16x128xf32>
    %90 = arith.mulf %9, %87 : vector<16x128xf32>
    %91 = arith.mulf %19, %89 : vector<16x128xf32>
    %92 = arith.addf %90, %91 : vector<16x128xf32>
    %c0_20 = arith.constant 0 : index
    %c0_21 = arith.constant 0 : index
    %93 = vector.load %arg1[%c0_20, %c0_21] : memref<16x1xi32, #tpu.memory_space<vmem>>, vector<16x1xi32>
    %94 = tpu.iota {dimensions = array<i32: 1>} : vector<16x48xi32>
    %95 = vector.broadcast %93 : vector<16x1xi32> to vector<16x48xi32>
    %96 = arith.cmpi eq, %94, %95 : vector<16x48xi32>
    %97 = arith.extui %96 : vector<16x48xi1> to vector<16x48xi32>
    %98 = arith.sitofp %97 : vector<16x48xi32> to vector<16x48xf32>
    %c0_22 = arith.constant 0 : index
    %c0_23 = arith.constant 0 : index
    %99 = vector.load %arg3[%c0_22, %c0_23] : memref<72x128xf32, #tpu.memory_space<vmem>>, vector<48x128xf32>
    %cst_24 = arith.constant dense<0.000000e+00> : vector<16x128xf32>
    %100 = tpu.matmul %98, %99, %cst_24 {dimension_numbers = #tpu.dot_dimension_numbers<[1], [0], [0], [1], [0, 0, 1, 1], [], []>} : vector<16x48xf32>, vector<48x128xf32>, vector<16x128xf32> -> vector<16x128xf32>
    %cst_25 = arith.constant 5.000000e-01 : f32
    %101 = vector.broadcast %cst_25 : f32 to vector<16x128xf32>
    %102 = arith.mulf %101, %2 : vector<16x128xf32>
    %c70 = arith.constant 70 : index
    %c0_26 = arith.constant 0 : index
    %103 = vector.load %arg3[%c70, %c0_26] : memref<72x128xf32, #tpu.memory_space<vmem>>, vector<1x128xf32>
    %104 = vector.broadcast %103 : vector<1x128xf32> to vector<16x128xf32>
    %105 = arith.mulf %104, %102 : vector<16x128xf32>
    %106 = math.tanh %102 : vector<16x128xf32>
    %cst_27 = arith.constant 1.000000e+00 : f32
    %107 = vector.broadcast %cst_27 : f32 to vector<16x128xf32>
    %108 = arith.addf %106, %107 : vector<16x128xf32>
    %109 = arith.mulf %105, %108 : vector<16x128xf32>
    %110 = arith.mulf %92, %100 : vector<16x128xf32>
    %111 = arith.addf %110, %109 : vector<16x128xf32>
    %cst_28 = arith.constant 1.000000e+00 : f32
    %112 = vector.broadcast %cst_28 : f32 to vector<128x1xf32>
    %cst_29 = arith.constant dense<0.000000e+00> : vector<16x1xf32>
    %113 = tpu.matmul %111, %112, %cst_29 {dimension_numbers = #tpu.dot_dimension_numbers<[1], [0], [0], [1], [0, 0, 1, 1], [], []>} : vector<16x128xf32>, vector<128x1xf32>, vector<16x1xf32> -> vector<16x1xf32>
    %c0_30 = arith.constant 0 : index
    %c0_31 = arith.constant 0 : index
    %114 = vector.load %arg4[%c0_30, %c0_31] : memref<16x1xf32, #tpu.memory_space<vmem>>, vector<16x1xf32>
    tpu.vector_store %arg4[%c0_30, %c0_31], %113 {strides = array<i32>} : memref<16x1xf32, #tpu.memory_space<vmem>>, vector<16x1xf32>,
    return
  }
  func.func @transform_0(%arg0: i32) -> (i32, i32) {
    %c0_i32 = arith.constant 0 : i32
    %c0_i32_0 = arith.constant 0 : i32
    return %arg0, %c0_i32 : i32, i32
  }
  func.func @transform_1(%arg0: i32) -> (i32, i32) {
    %c0_i32 = arith.constant 0 : i32
    %c0_i32_0 = arith.constant 0 : i32
    return %arg0, %c0_i32 : i32, i32
  }
  func.func @transform_2(%arg0: i32) -> (i32, i32) {
    %c0_i32 = arith.constant 0 : i32
    %c0_i32_0 = arith.constant 0 : i32
    %c0_i32_1 = arith.constant 0 : i32
    return %c0_i32, %c0_i32_0 : i32, i32
  }
  func.func @transform_3(%arg0: i32) -> (i32, i32) {
    %c0_i32 = arith.constant 0 : i32
    %c0_i32_0 = arith.constant 0 : i32
    return %arg0, %c0_i32 : i32, i32
  }
}

</mosaic_0001>

<bundles_post_ra>
// kernel: tpu_custom_call.1
= control target key start
LH: loop header
LB: loop body
LE: loop exit
PB: predicated region body
PF: predicated region fallthrough
CT: control target
= control target key end

     0   :  { %8 = vsyncpa [#allocation3], 0  ;;  %s647_s12 = smov [#allocation2]   ;;  %s802_s0 = inlined_call_operand.vmem [shape: s32[16,1], index: 0, kind: input, shape index: {}]   ;;  %s803_s1 = inlined_call_operand.vmem [shape: f32[16,8], index: 1, kind: input, shape index: {}]   ;;  %s804_s2 = inlined_call_operand.hbm [shape: f32[72,128], index: 2, kind: input, shape index: {}]   ;;  %s805_s3 = inlined_call_operand.vmem [shape: f32[16,1], index: 3, kind: output, shape index: {}]  }
   0x1   :  { %s18_s13 = sshll.u32 %s647_s12, 4  ;;  %s623_s16 = scalar_lea.hbm %s804_s2, 1152  ;;  %s19_s13 = int_to_ptr.vmem [resolvable:$true] %s18_s13 }
   0x2   :  { %p624_p0 = scmp.ne.s32.totalorder %s804_s2, %s623_s16  ;;  %p627_p1 = scmp.lt.u32.totalorder %s623_s16, %s804_s2 }
   0x4   :  { %p629_p2 = pnand %p627_p1, %p624_p0 }
   0x6   :  { %632 = shalt.err (!%p629_p2)
}
   0x7   :  { %s633_s21 = scalar_lea.vmem %s19_s13, 1152  ;;  %p638_p4 = scmp.lt.s32.totalorder %s19_s13, %s19_s13 }
   0x8   :  { %p634_p3 = scmp.ne.s32.totalorder %s19_s13, %s633_s21  ;;  %p639_p5 = scmp.lt.s32.totalorder %s633_s21, %s633_s21 }
   0xa   :  { %p640_p6 = por %p639_p5, %p638_p4 }
   0xc   :  { %p641_p7 = pnand %p640_p6, %p634_p3 }
   0xe   :  { %644 = shalt.err (!%p641_p7)
}
   0xf   :  { %s648_s22 = smov 128   ;;  %s649_s23 = smov 8  }
  0x10   :  { %24 = dma.hbm_to_vmem [thread:$0]  %s804_s2, 1152, %s19_s13, [#allocation3], %s648_s22, %s648_s22, %s649_s23  }
  0x11   :  { %645 = dma.done.wait [#allocation3], 1152  }
  0x12   :  { %646 = vsyncadd [#allocation3], 4294966144  ;;  %v650_v0 = vmov 0   ;;  %vm31_vm0 = vcmask 64512   ;;  %v273_v1 = vld [vmem:[%s802_s0] sm:$0xff]  ;;  %v274_v2 = vld [vmem:[%s802_s0 + $0x8] sm:$0xff]  ;;  %v275_v16 = vlaneseq }
  0x13   :  { %618 = vset.pattern.permute.xlu0 %v650_v0  ;;  %v30_v3 = vld [vmem:[#allocation2 + $0x30] sm:$0xff]  ;;  %v28_v4 = vld [vmem:[%s803_s1] sm:$0xff]  ;;  %v29_v5 = vld [vmem:[%s803_s1 + $0x8] sm:$0xff]  ;;  %v651_v15 = vmov 1.0|1.0   ;;  %vm295_vm1 = vcmask 392192  }
  0x14   :  { %278 = vperm.xlu0 %618, %v273_v1   ;;  %529 = vmatprep.subr.mxu1 %v30_v3  ;;  %v289_v6 = vld [vmem:[#allocation2] sm:$0xff]  ;;  %v290_v7 = vld [vmem:[#allocation2 + $0x8] sm:$0xff]  ;;  %v291_v8 = vld [vmem:[#allocation2 + $0x10] sm:$0xff]  ;;  %v276_v17 = vand.u32 127, %v275_v16  ;;  %v652_v19 = vmov 0.0  }
  0x15   :  { %530 = vmatpush3.msra.mxu1 %v30_v3  ;;  %531 = vmatprep.mubr.msk.f32.mxu1 %vm31_vm0, %v28_v4  ;;  %v292_v9 = vld [vmem:[#allocation2 + $0x18] sm:$0xff]  ;;  %v584_v10 = vpack.c.bf16 %v290_v7, %v289_v6  ;;  %v293_v12 = vld [vmem:[#allocation2 + $0x20] sm:$0xff]  ;;  %v294_v13 = vld [vmem:[#allocation2 + $0x28] sm:$0xff] }
  0x16   :  { %532 = vmatmul.mubr.msk.f32.vlgmr.msra.gmra.mrb[0].mxu1 %vm31_vm0, %v29_v5  ;;  %v588_v11 = vpack.c.bf16 %v292_v9, %v291_v8  ;;  %v592_v14 = vpack.c.bf16 %v294_v13, %v293_v12  ;;  %596 = vmatprep.subr.bf16.mxu0 %v651_v15  ;;  %v481_v25 = vld [vmem:[#allocation2 + $0x38] ss:$0 sm:$0xff]  ;;  %v482_v26 = vld [vmem:[#allocation2 + $0x39] ss:$0 sm:$0xff]  ;;  %v483_v27 = vld [vmem:[#allocation2 + $0x3a] ss:$0 sm:$0xff] }
  0x17   :  { %585 = vmatprep.subr.bf16.mxu1 %v584_v10  ;;  %597 = vmatpush3.bf16.msra.mxu0 %v651_v15  ;;  %v484_v28 = vld [vmem:[#allocation2 + $0x3b] ss:$0 sm:$0xff]  ;;  %v485_v29 = vld [vmem:[#allocation2 + $0x3c] ss:$0 sm:$0xff]  ;;  %v486_v34 = vld [vmem:[#allocation2 + $0x3d] ss:$0 sm:$0xff] }
  0x18   :  { %281 = vperm.xlu0 %618, %v274_v2   ;;  %587 = vmatpush3.bf16.msra.mxu1 %v584_v10  ;;  %v487_v35 = vld [vmem:[#allocation2 + $0x3e] ss:$0 sm:$0xff]  ;;  %v488_v39 = vld [vmem:[#allocation2 + $0x3f] ss:$0 sm:$0xff]  ;;  %v489_v40 = vld [vmem:[#allocation2 + $0x40] ss:$0 sm:$0xff] }
  0x19   :  { %589 = vmatprep.subr.bf16.mxu1 %v588_v11  ;;  %598 = vmatprep.subr.bf16.mxu0 %v651_v15  ;;  %v490_v12 = vld [vmem:[#allocation2 + $0x41] ss:$0 sm:$0xff]  ;;  %v491_v13 = vld [vmem:[#allocation2 + $0x42] ss:$0 sm:$0xff] }
  0x1b   :  { %599 = vmatpush3.bf16.msra.mxu0 %v651_v15 }
  0x1c   :  { %591 = vmatpush3.bf16.msra.mxu1 %v588_v11  ;;  %600 = vmatprep.subr.bf16.mxu0 %v651_v15 }
  0x1d   :  { %593 = vmatprep.subr.bf16.mxu1 %v592_v14 }
  0x1f   :  { %601 = vmatpush3.bf16.msra.mxu0 %v651_v15 }
  0x20   :  { %595 = vmatpush3.bf16.msra.mxu1 %v592_v14  ;;  %602 = vmatprep.subr.bf16.mxu0 %v651_v15  ;;  %v492_v14 = vld [vmem:[#allocation2 + $0x43] ss:$0 sm:$0xff] }
  0x23   :  { %603 = vmatpush3.bf16.msra.mxu0 %v651_v15 }
  0x24   :  { %604 = vmatprep.subr.bf16.mxu0 %v651_v15 }
  0x27   :  { %605 = vmatpush3.bf16.msra.mxu0 %v651_v15 }
  0x28   :  { %606 = vmatprep.subr.bf16.mxu0 %v651_v15 }
  0x2b   :  { %607 = vmatpush3.bf16.msra.mxu0 %v651_v15 }
  0x2c   :  { %608 = vmatprep.subr.bf16.mxu0 %v651_v15 }
  0x2f   :  { %609 = vmatpush3.bf16.msra.mxu0 %v651_v15 }
  0x30   :  { %610 = vmatprep.subr.bf16.mxu0 %v651_v15 }
  0x33   :  { %611 = vmatpush3.bf16.msra.mxu0 %v651_v15 }
  0x93   :  { %v279_v18 = vpop.permute.xlu0 %278 }
  0x94   :  { %vm283_vm2 = vcmp.eq.s32.totalorder %v276_v17, %v279_v18 }
  0x95   :  { %v495_v20 = vsel %vm283_vm2, 1.0, %v652_v19 }
  0x96   :  { %546 = vmatprep.mubr.msk.f32.mxu1 %vm295_vm1, %v495_v20 }
  0x97   :  { %v282_v21 = vpop.permute.xlu0 %281 }
  0x98   :  { %vm284_vm3 = vcmp.eq.s32.totalorder %v276_v17, %v282_v21 }
  0x99   :  { %v496_v22 = vsel %vm284_vm3, 1.0, %v652_v19 }
  0x9a   :  { %547 = vmatmul.mubr.msk.f32.vlgmr.msra.gmra.mrb[2].mxu1 %vm295_vm1, %v496_v22 }
  0xe9   :  { %v697_v23 = vpop.f32.mrb[0].mxu1 }
  0xea   :  { %v699_v24 = vpop.f32.mrb[1].mxu1  ;;  %vm151_vm4 = vcmp.ge.f32.partialorder %v697_v23, %v481_v25  ;;  %vm153_vm5 = vcmp.lt.f32.partialorder %v697_v23, %v482_v26  ;;  %vm157_vm6 = vcmp.ge.f32.partialorder %v697_v23, %v482_v26  ;;  %vm159_vm7 = vcmp.lt.f32.partialorder %v697_v23, %v483_v27 }
  0xeb   :  { %vm163_vm8 = vcmp.ge.f32.partialorder %v697_v23, %v483_v27  ;;  %vm165_vm9 = vcmp.lt.f32.partialorder %v697_v23, %v484_v28  ;;  %vm707_vm10 = vmand %vm151_vm4, %vm153_vm5  ;;  %vm169_vm11 = vcmp.ge.f32.partialorder %v697_v23, %v484_v28  ;;  %vm171_vm12 = vcmp.lt.f32.partialorder %v697_v23, %v485_v29 }
  0xec   :  { %vm713_vm13 = vmand %vm157_vm6, %vm159_vm7  ;;  %vm150_vm14 = vcmp.ge.f32.partialorder %v699_v24, %v481_v25  ;;  %vm152_vm15 = vcmp.lt.f32.partialorder %v699_v24, %v482_v26  ;;  %vm156_vm1 = vcmp.ge.f32.partialorder %v699_v24, %v482_v26  ;;  %vm158_vm2 = vcmp.lt.f32.partialorder %v699_v24, %v483_v27 }
  0xed   :  { %vm719_vm0 = vmand %vm163_vm8, %vm165_vm9  ;;  %vm162_vm4 = vcmp.ge.f32.partialorder %v699_v24, %v483_v27  ;;  %vm164_vm5 = vcmp.lt.f32.partialorder %v699_v24, %v484_v28  ;;  %vm168_vm7 = vcmp.ge.f32.partialorder %v699_v24, %v484_v28  ;;  %vm170_vm8 = vcmp.lt.f32.partialorder %v699_v24, %v485_v29 }
  0xee   :  { %vm725_vm3 = vmand %vm169_vm11, %vm171_vm12  ;;  %v738_v37 = vsub.f32 %v697_v23, %v481_v25  ;;  %v129_v38 = vsub.f32 %v697_v23, %v482_v26  ;;  %v135_v42 = vsub.f32 %v697_v23, %v483_v27  ;;  %v137_v43 = vsub.f32 %v483_v27, %v697_v23 }
  0xef   :  { %vm731_vm6 = vmand %vm150_vm14, %vm152_vm15  ;;  %v143_v44 = vsub.f32 %v484_v28, %v697_v23  ;;  %v749_v45 = vsub.f32 %v485_v29, %v697_v23  ;;  %v183_v46 = vsel %vm707_vm10, %v486_v34, 0.0  ;;  %v189_v47 = vsel %vm713_vm13, %v487_v35, 0.0 }
  0xf0   :  { %vm741_vm9 = vmand %vm156_vm1, %vm158_vm2  ;;  %v760_v48 = vsub.f32 %v699_v24, %v481_v25  ;;  %v128_v49 = vsub.f32 %v699_v24, %v482_v26  ;;  %v195_v51 = vsel %vm719_vm0, %v488_v39, 0.0  ;;  %v201_v52 = vsel %vm725_vm3, %v489_v40, 0.0 }
  0xf1   :  { %vm166_vm11 = vmand %vm162_vm4, %vm164_vm5  ;;  %v134_v53 = vsub.f32 %v699_v24, %v483_v27  ;;  %v136_v54 = vsub.f32 %v483_v27, %v699_v24  ;;  %v142_v55 = vsub.f32 %v484_v28, %v699_v24  ;;  %v148_v56 = vsub.f32 %v485_v29, %v699_v24 }
  0xf2   :  { %vm767_vm12 = vmand %vm168_vm7, %vm170_vm8  ;;  %v182_v57 = vsel %vm731_vm6, %v486_v34, 0.0  ;;  %v188_v58 = vsel %vm741_vm9, %v487_v35, 0.0  ;;  %v194_v59 = vsel %vm166_vm11, %v488_v39, 0.0  ;;  %v203_v61 = vmul.f32 %v183_v46, %v738_v37  ;;  %v493_v39 = vld [vmem:[#allocation2 + $0x44] ss:$0 sm:$0xff] }
  0xf3   :  { %v200_v60 = vsel %vm767_vm12, %v489_v40, 0.0  ;;  %v205_v62 = vmul.f32 %v189_v47, %v137_v43  ;;  %v209_v63 = vmul.f32 %v189_v47, %v129_v38  ;;  %v211_v0 = vmul.f32 %v195_v51, %v143_v44  ;;  %v494_v40 = vld [vmem:[#allocation2 + $0x45] ss:$0 sm:$0xff] }
  0xf4   :  { %v215_v1 = vmul.f32 %v195_v51, %v135_v42  ;;  %v217_v2 = vmul.f32 %v201_v52, %v749_v45  ;;  %v202_v3 = vmul.f32 %v182_v57, %v760_v48  ;;  %v204_v4 = vmul.f32 %v188_v58, %v136_v54 }
  0xf5   :  { %v208_v5 = vmul.f32 %v188_v58, %v128_v49  ;;  %v210_v6 = vmul.f32 %v194_v59, %v142_v55  ;;  %v214_v7 = vmul.f32 %v194_v59, %v134_v53  ;;  %v216_v8 = vmul.f32 %v200_v60, %v148_v56 }
  0xf6   :  { %v207_v9 = vadd.f32 %v205_v62, %v203_v61  ;;  %v213_v10 = vadd.f32 %v211_v0, %v209_v63  ;;  %v219_v11 = vadd.f32 %v217_v2, %v215_v1  ;;  %v206_v15 = vadd.f32 %v204_v4, %v202_v3 }
  0xf7   :  { %v212_v16 = vadd.f32 %v210_v6, %v208_v5  ;;  %v218_v17 = vadd.f32 %v216_v8, %v214_v7  ;;  %v378_v18 = vmul.f32 0.5, %v697_v23  ;;  %v377_v27 = vmul.f32 0.5, %v699_v24 }
  0xf8   :  { %v228_v19 = vmul.f32 %v490_v12, %v207_v9  ;;  %v234_v20 = vmul.f32 %v491_v13, %v213_v10  ;;  %v240_v21 = vmul.f32 %v492_v14, %v219_v11  ;;  %v227_v22 = vmul.f32 %v490_v12, %v206_v15 }
  0xf9   :  { %v233_v25 = vmul.f32 %v491_v13, %v212_v16  ;;  %v239_v26 = vmul.f32 %v492_v14, %v218_v17  ;;  %619 = vtanh.f32 %v378_v18  ;;  %vm471_vm10 = vcmask 7168  }
  0xfa   :  { %v242_v28 = vmul.f32 %v228_v19, %v738_v37  ;;  %v244_v29 = vmul.f32 %v234_v20, %v143_v44  ;;  %v248_v30 = vmul.f32 %v234_v20, %v129_v38  ;;  %v250_v31 = vmul.f32 %v240_v21, %v749_v45  ;;  %v499_v38 = vld [vmem:[#allocation2 + $0x46] ss:$0 sm:$0xff] }
  0xfb   :  { %v241_v32 = vmul.f32 %v227_v22, %v760_v48  ;;  %v243_v33 = vmul.f32 %v233_v25, %v142_v55  ;;  %v247_v34 = vmul.f32 %v233_v25, %v128_v49  ;;  %v249_v23 = vmul.f32 %v239_v26, %v148_v56 }
  0xfc   :  { %621 = vtanh.f32 %v377_v27  ;;  %v246_v35 = vadd.f32 %v244_v29, %v242_v28  ;;  %v252_v36 = vadd.f32 %v250_v31, %v248_v30  ;;  %v385_v54 = vmul.f32 %v499_v38, %v378_v18 }
  0xfd   :  { %v245_v41 = vadd.f32 %v243_v33, %v241_v32  ;;  %v251_v42 = vadd.f32 %v249_v23, %v247_v34  ;;  %v384_v57 = vmul.f32 %v499_v38, %v377_v27 }
  0xfe   :  { %v260_v24 = vmul.f32 %v493_v39, %v246_v35  ;;  %v266_v43 = vmul.f32 %v494_v40, %v252_v36 }
  0xff   :  { %v259_v47 = vmul.f32 %v493_v39, %v245_v41  ;;  %v265_v44 = vmul.f32 %v494_v40, %v251_v42 }
 0x100   :  { %v268_v51 = vmul.f32 %v260_v24, %v738_v37  ;;  %v270_v52 = vmul.f32 %v266_v43, %v749_v45 }
 0x101   :  { %v267_v49 = vmul.f32 %v259_v47, %v760_v48  ;;  %v269_v53 = vmul.f32 %v265_v44, %v148_v56 }
 0x102   :  { %v272_v59 = vadd.f32 %v270_v52, %v268_v51 }
 0x103   :  { %v620_v46 = vpop.eup %619  ;;  %v271_v61 = vadd.f32 %v269_v53, %v267_v49 }
 0x104   :  { %v389_v55 = vadd.f32 1.0, %v620_v46 }
 0x106   :  { %v622_v50 = vpop.eup %621  ;;  %v391_v62 = vmul.f32 %v389_v55, %v385_v54 }
 0x107   :  { %v388_v58 = vadd.f32 1.0, %v622_v50 }
 0x109   :  { %v390_v2 = vmul.f32 %v388_v58, %v384_v57 }
 0x16d   :  { %v548_v60 = vpop.f32.mrb[2].mxu1 }
 0x16e   :  { %v393_v63 = vmul.f32 %v548_v60, %v272_v59  ;;  %v368_v0 = vpop.f32.mrb[3].mxu1 }
 0x16f   :  { %v392_v1 = vmul.f32 %v368_v0, %v271_v61 }
 0x170   :  { %v395_v3 = vadd.f32 %v393_v63, %v391_v62 }
 0x171   :  { %v394_v4 = vadd.f32 %v392_v1, %v390_v2 }
 0x173   :  { %581 = vmatprep.mubr.f32.mxu0 %v394_v4 }
 0x174   :  { %582 = vmatmul.mubr.f32.vlgmr.msra.gmra.mrb[0].mxu0 %v395_v3 }
 0x247   :  { %v583_v37 = vpop.f32.mrb[0].mxu0 }
 0x248   :  { %473 = vst.msk [vmem:[%s805_s3 + $0x8] sm:$0xff] %vm471_vm10, %v583_v37  ;;  %v462_v45 = vpop.f32.mrb[1].mxu0 }
 0x249   :  { %472 = vst.msk [vmem:[%s805_s3] sm:$0xff] %vm471_vm10, %v462_v45 }
 0x24a   :  { %478 = vsyncpa [#allocation3], 1 }

</bundles_post_ra>
